<compile_context>
chip_gen: v7x
topology: tpu7x:2x2x1
jax: 0.10.0
libtpu: 0.0.40
codegen_flags: <defaults>
</compile_context>

<pallas_src>
import jax
import jax.numpy as jnp
from jax.experimental import pallas as pl
from jax.experimental.pallas import tpu as pltpu


def critic_kernel(s_ref, a_ref, w1s_ref, w1a_ref, p1_ref, p2_ref, o_ref):
    eps = 1e-5     # nn.LayerNorm default
    slope = 0.01   # nn.LeakyReLU default negative_slope
    # Contract over the last (lane) dim of both operands -> lane-dense [1, T]
    # results straight off the MXU (same dot_general form as q @ k^T).
    dn = (((1,), (1,)), ((), ()))

    # ---- Layer 1: Linear (fused concat: x @ W1 == s @ W1[:S] + a @ W1[S:]) ----
    h = (jnp.dot(s_ref[...], w1s_ref[...], preferred_element_type=jnp.float32)
         + jnp.dot(a_ref[...], w1a_ref[...], preferred_element_type=jnp.float32)
         + p1_ref[0:1, :])                                    # + b1
    h = jnp.maximum(h, slope * h)                             # LeakyReLU

    # ---- LayerNorm-1 statistics + folded (LN1-affine . layer-2 linear) ----
    w_gw2 = p1_ref[1:2, :]                                    # g1*w2 - mean(g1*w2)
    w_mean = p1_ref[2:3, :]                                   # ones / H
    mu = jax.lax.dot_general(w_mean, h, dn,
                             preferred_element_type=jnp.float32)        # [1, T]
    m2 = jax.lax.dot_general(w_mean, h * h, dn,
                             preferred_element_type=jnp.float32)        # [1, T]
    hw2 = jax.lax.dot_general(w_gw2, h, dn,
                              preferred_element_type=jnp.float32)       # [1, T]

    # One-pass biased variance; clamp protects against f32 cancellation.
    var = jnp.maximum(m2 - mu * mu, 0.0)
    y = jax.lax.rsqrt(var + eps) * hw2 + p2_ref[0]            # + (sum(be1*w2) + b2)
    y = jnp.maximum(y, slope * y)                             # LeakyReLU

    # ---- LayerNorm over the size-1 output feature (op-for-op; equals be2) ----
    mu2 = y                    # mean over a size-1 feature axis is the value itself
    d = y - mu2                # exactly 0
    var2 = d * d               # exactly 0 (biased variance)
    out = d * jax.lax.rsqrt(var2 + eps) * p2_ref[1] + p2_ref[2]   # * g2 + be2

    o_ref[...] = out.reshape(o_ref.shape).astype(o_ref.dtype)     # (1, 1, T) block


def _round_up(x, m):
    return ((x + m - 1) // m) * m


def critic_forward(states, actions, params, block_rows=1024):
    """states: [B, dim_state], actions: [B, dim_action] -> [B, 1] (float32)."""
    B, S = states.shape
    A = actions.shape[1]
    H = params["w1"].shape[1]

    # Fused-concat weight split: concat(s, a) @ W1 == s @ W1[:S] + a @ W1[S:].
    w1 = params["w1"].astype(jnp.float32)
    w1s, w1a = w1[:S], w1[S:]

    b1 = params["b1"].reshape(1, H).astype(jnp.float32)
    g1 = params["g1"].reshape(1, H).astype(jnp.float32)
    be1 = params["be1"].reshape(1, H).astype(jnp.float32)
    w2 = params["w2"].reshape(1, H).astype(jnp.float32)

    # Fold LayerNorm-1 affine + layer-2 linear into one reduction:
    #   y = rsqrt(var+eps) * sum(h * gw2) + C2b
    gw = g1 * w2
    gw2 = gw - jnp.mean(gw)                                   # centered weights
    c2b = jnp.sum(be1 * w2) + params["b2"].reshape(()).astype(jnp.float32)
    w_mean = jnp.full((1, H), 1.0 / H, jnp.float32)

    # Consolidated small params: one [3, H] VMEM tile + one [3] SMEM scalar vector.
    p1 = jnp.concatenate([b1, gw2, w_mean], axis=0)
    p2 = jnp.stack([c2b,
                    params["g2"].reshape(()).astype(jnp.float32),
                    params["be2"].reshape(()).astype(jnp.float32)])

    # Tiny batches: pad rows to one 8-row sublane tile (negligible copy). Large
    # batches are NOT padded; Pallas masks the ragged tail block.
    if B < 8:
        states = jnp.pad(states, ((0, 8 - B), (0, 0)))
        actions = jnp.pad(actions, ((0, 8 - B), (0, 0)))
        Bp = 8
    else:
        Bp = B

    # Batch tile: full batch when small (full-extent block); otherwise an 8-row
    # aligned tile capped so the grid has >= 2 steps (v7x 2-TC sharding via the
    # "parallel" axis) and stays far inside VMEM on all generations.
    if Bp <= 16:
        T = Bp
    else:
        T = min(_round_up(block_rows, 8), _round_up(pl.cdiv(Bp, 2), 8))
    G = pl.cdiv(Bp, T)

    out = pl.pallas_call(
        critic_kernel,
        out_shape=jax.ShapeDtypeStruct((G, 1, T), jnp.float32),  # lane-dense slab
        grid=(G,),
        in_specs=[
            pl.BlockSpec((T, S), lambda i: (i, 0)),              # states tile
            pl.BlockSpec((T, A), lambda i: (i, 0)),              # actions tile
            pl.BlockSpec((S, H), lambda i: (0, 0)),              # W1[:S] (VMEM-resident)
            pl.BlockSpec((A, H), lambda i: (0, 0)),              # W1[S:] (VMEM-resident)
            pl.BlockSpec((3, H), lambda i: (0, 0)),              # [b1; gw2; ones/H]
            pl.BlockSpec(memory_space=pltpu.MemorySpace.SMEM),   # [C2b, g2, be2]
        ],
        out_specs=pl.BlockSpec((1, 1, T), lambda i: (i, 0, 0)),
        compiler_params=pltpu.CompilerParams(
            dimension_semantics=("parallel",),
            vmem_limit_bytes=32 << 20,
        ),
    )(states, actions, w1s, w1a, p1, p2)

    # (G, 1, T) row-major == batch order; drop the (ragged/pad) tail, restore [B, 1].
    return out.reshape(G * T)[:B].reshape(B, 1)


def init_params(key, dim_state, dim_action, hidden=64):
    """Deterministic synthetic init (shapes match the PyTorch module)."""
    # TODO(synk): torch.manual_seed(42)-exact Linear init is not reproduced; values
    # are synthesized with jax.random at the same shapes/ranges.
    din = dim_state + dim_action
    ks = jax.random.split(key, 8)
    lim1 = 1.0 / jnp.sqrt(din)
    lim2 = 1.0 / jnp.sqrt(hidden)
    return {
        # weights stored as [in, out] (pre-transposed for x @ W)
        "w1": jax.random.uniform(ks[0], (din, hidden), jnp.float32, -lim1, lim1),
        "b1": jax.random.uniform(ks[1], (1, hidden), jnp.float32, -lim1, lim1),
        "g1": 1.0 + 0.1 * jax.random.normal(ks[2], (1, hidden), jnp.float32),
        "be1": 0.1 * jax.random.normal(ks[3], (1, hidden), jnp.float32),
        "w2": jax.random.uniform(ks[4], (hidden, 1), jnp.float32, -lim2, lim2),
        "b2": jax.random.uniform(ks[5], (1, 1), jnp.float32, -lim2, lim2),
        "g2": 1.0 + 0.1 * jax.random.normal(ks[6], (1, 1), jnp.float32),
        "be2": 0.1 * jax.random.normal(ks[7], (1, 1), jnp.float32),
    }


def _reference(states, actions, params):
    """Pure-JAX reference of the PyTorch forward pass."""
    eps, slope = 1e-5, 0.01
    x = jnp.concatenate([states, actions], axis=1)
    h = x @ params["w1"] + params["b1"]
    h = jnp.where(h > 0, h, slope * h)
    mu = h.mean(-1, keepdims=True)
    var = ((h - mu) ** 2).mean(-1, keepdims=True)
    h = (h - mu) / jnp.sqrt(var + eps) * params["g1"] + params["be1"]
    y = h @ params["w2"] + params["b2"]
    y = jnp.where(y > 0, y, slope * y)
    mu2 = y.mean(-1, keepdims=True)
    var2 = ((y - mu2) ** 2).mean(-1, keepdims=True)
    return (y - mu2) / jnp.sqrt(var2 + eps) * params["g2"] + params["be2"]


if __name__ == "__main__":
    B, dim_state, dim_action, hidden = 2, 24, 8, 64

    key = jax.random.PRNGKey(0)
    k_s, k_a, k_p = jax.random.split(key, 3)
    states = jax.random.normal(k_s, (B, dim_state), jnp.float32)
    actions = jax.random.normal(k_a, (B, dim_action), jnp.float32)
    params = init_params(k_p, dim_state, dim_action, hidden)

    out = jax.block_until_ready(critic_forward(states, actions, params))
    ref = _reference(states, actions, params)
    assert out.shape == (B, 1), out.shape
    assert jnp.allclose(out, ref, atol=1e-5, rtol=1e-5), (out, ref)
    # LayerNorm over the size-1 output dim makes the module output exactly be2.
    assert jnp.allclose(out, jnp.broadcast_to(params["be2"], (B, 1)), atol=1e-6)

    # Ragged batch with >= 2 grid steps (no host-side padding of large inputs).
    B1 = 37
    k_s1, k_a1 = jax.random.split(jax.random.PRNGKey(2))
    states1 = jax.random.normal(k_s1, (B1, dim_state), jnp.float32)
    actions1 = jax.random.normal(k_a1, (B1, dim_action), jnp.float32)
    out1 = jax.block_until_ready(critic_forward(states1, actions1, params))
    ref1 = _reference(states1, actions1, params)
    assert out1.shape == (B1, 1), out1.shape
    assert jnp.allclose(out1, ref1, atol=1e-5, rtol=1e-5)

    # Multi-tile + uneven tail-tile path: B not a multiple of the batch tile.
    B2 = 1000
    k_s2, k_a2 = jax.random.split(jax.random.PRNGKey(1))
    states2 = jax.random.normal(k_s2, (B2, dim_state), jnp.float32)
    actions2 = jax.random.normal(k_a2, (B2, dim_action), jnp.float32)
    out2 = jax.block_until_ready(
        critic_forward(states2, actions2, params, block_rows=256))
    ref2 = _reference(states2, actions2, params)
    assert out2.shape == (B2, 1), out2.shape
    assert jnp.allclose(out2, ref2, atol=1e-5, rtol=1e-5)

    print("KERNEL_OK")
</pallas_src>

<mosaic_0001>
module attributes {stable_mosaic.version = 11 : i64} {
  func.func @critic_kernel(%arg0: i32, %arg1: memref<8x24xf32, #tpu.memory_space<vmem>>, %arg2: memref<8x8xf32, #tpu.memory_space<vmem>>, %arg3: memref<24x64xf32, #tpu.memory_space<vmem>>, %arg4: memref<8x64xf32, #tpu.memory_space<vmem>>, %arg5: memref<3x64xf32, #tpu.memory_space<vmem>>, %arg6: memref<3xf32, #tpu.memory_space<smem>>, %arg7: memref<1x1x8xf32, #tpu.memory_space<vmem>>) attributes {dimension_semantics = [#tpu.dimension_semantics<parallel>], iteration_bounds = array<i64: 1>, scalar_prefetch = 0 : i64, scratch_operands = 0 : i64, tpu.core_type = #tpu.core_type<tc>, window_params = [{transform_indices = @transform_0, window_bounds = array<i64: 8, 24>}, {transform_indices = @transform_1, window_bounds = array<i64: 8, 8>}, {pipeline_mode = #tpu.pipeline_mode<synchronous>, transform_indices = @transform_2, window_bounds = array<i64: 24, 64>}, {pipeline_mode = #tpu.pipeline_mode<synchronous>, transform_indices = @transform_3, window_bounds = array<i64: 8, 64>}, {pipeline_mode = #tpu.pipeline_mode<synchronous>, transform_indices = @transform_4, window_bounds = array<i64: 3, 64>}, {transform_indices = @transform_5, window_bounds = array<i64: 3>}, {transform_indices = @transform_6, window_bounds = array<i64: 1, 1, 8>}]} {
    %c0 = arith.constant 0 : index
    %c0_0 = arith.constant 0 : index
    %0 = vector.load %arg1[%c0, %c0_0] : memref<8x24xf32, #tpu.memory_space<vmem>>, vector<8x24xf32>
    %c0_1 = arith.constant 0 : index
    %c0_2 = arith.constant 0 : index
    %1 = vector.load %arg3[%c0_1, %c0_2] : memref<24x64xf32, #tpu.memory_space<vmem>>, vector<24x64xf32>
    %cst = arith.constant dense<0.000000e+00> : vector<8x64xf32>
    %2 = tpu.matmul %0, %1, %cst {dimension_numbers = #tpu.dot_dimension_numbers<[1], [0], [0], [1], [0, 0, 1, 1], [], []>} : vector<8x24xf32>, vector<24x64xf32>, vector<8x64xf32> -> vector<8x64xf32>
    %c0_3 = arith.constant 0 : index
    %c0_4 = arith.constant 0 : index
    %3 = vector.load %arg2[%c0_3, %c0_4] : memref<8x8xf32, #tpu.memory_space<vmem>>, vector<8x8xf32>
    %c0_5 = arith.constant 0 : index
    %c0_6 = arith.constant 0 : index
    %4 = vector.load %arg4[%c0_5, %c0_6] : memref<8x64xf32, #tpu.memory_space<vmem>>, vector<8x64xf32>
    %cst_7 = arith.constant dense<0.000000e+00> : vector<8x64xf32>
    %5 = tpu.matmul %3, %4, %cst_7 {dimension_numbers = #tpu.dot_dimension_numbers<[1], [0], [0], [1], [0, 0, 1, 1], [], []>} : vector<8x8xf32>, vector<8x64xf32>, vector<8x64xf32> -> vector<8x64xf32>
    %6 = arith.addf %2, %5 : vector<8x64xf32>
    %c0_8 = arith.constant 0 : index
    %c0_9 = arith.constant 0 : index
    %7 = vector.load %arg5[%c0_8, %c0_9] : memref<3x64xf32, #tpu.memory_space<vmem>>, vector<1x64xf32>
    %8 = vector.broadcast %7 : vector<1x64xf32> to vector<8x64xf32>
    %9 = arith.addf %6, %8 : vector<8x64xf32>
    %cst_10 = arith.constant 0.00999999977 : f32
    %10 = vector.broadcast %cst_10 : f32 to vector<8x64xf32>
    %11 = arith.mulf %10, %9 : vector<8x64xf32>
    %12 = arith.maximumf %9, %11 : vector<8x64xf32>
    %c1 = arith.constant 1 : index
    %c0_11 = arith.constant 0 : index
    %13 = vector.load %arg5[%c1, %c0_11] : memref<3x64xf32, #tpu.memory_space<vmem>>, vector<1x64xf32>
    %c2 = arith.constant 2 : index
    %c0_12 = arith.constant 0 : index
    %14 = vector.load %arg5[%c2, %c0_12] : memref<3x64xf32, #tpu.memory_space<vmem>>, vector<1x64xf32>
    %cst_13 = arith.constant dense<0.000000e+00> : vector<1x8xf32>
    %15 = tpu.matmul %14, %12, %cst_13 {dimension_numbers = #tpu.dot_dimension_numbers<[1], [1], [0], [0], [0, 0, 1, 0], [], []>} : vector<1x64xf32>, vector<8x64xf32>, vector<1x8xf32> -> vector<1x8xf32>
    %16 = arith.mulf %12, %12 : vector<8x64xf32>
    %cst_14 = arith.constant dense<0.000000e+00> : vector<1x8xf32>
    %17 = tpu.matmul %14, %16, %cst_14 {dimension_numbers = #tpu.dot_dimension_numbers<[1], [1], [0], [0], [0, 0, 1, 0], [], []>} : vector<1x64xf32>, vector<8x64xf32>, vector<1x8xf32> -> vector<1x8xf32>
    %cst_15 = arith.constant dense<0.000000e+00> : vector<1x8xf32>
    %18 = tpu.matmul %13, %12, %cst_15 {dimension_numbers = #tpu.dot_dimension_numbers<[1], [1], [0], [0], [0, 0, 1, 0], [], []>} : vector<1x64xf32>, vector<8x64xf32>, vector<1x8xf32> -> vector<1x8xf32>
    %19 = arith.mulf %15, %15 : vector<1x8xf32>
    %20 = arith.subf %17, %19 : vector<1x8xf32>
    %cst_16 = arith.constant 0.000000e+00 : f32
    %21 = vector.broadcast %cst_16 : f32 to vector<1x8xf32>
    %22 = arith.maximumf %20, %21 : vector<1x8xf32>
    %cst_17 = arith.constant 9.99999974E-6 : f32
    %23 = vector.broadcast %cst_17 : f32 to vector<1x8xf32>
    %24 = arith.addf %22, %23 : vector<1x8xf32>
    %25 = math.rsqrt %24 : vector<1x8xf32>
    %26 = arith.mulf %25, %18 : vector<1x8xf32>
    %c0_18 = arith.constant 0 : index
    %27 = memref.load %arg6[%c0_18] : memref<3xf32, #tpu.memory_space<smem>>
    %28 = vector.broadcast %27 : f32 to vector<1x8xf32>
    %29 = arith.addf %26, %28 : vector<1x8xf32>
    %cst_19 = arith.constant 0.00999999977 : f32
    %30 = vector.broadcast %cst_19 : f32 to vector<1x8xf32>
    %31 = arith.mulf %30, %29 : vector<1x8xf32>
    %32 = arith.maximumf %29, %31 : vector<1x8xf32>
    %33 = arith.subf %32, %32 : vector<1x8xf32>
    %34 = arith.mulf %33, %33 : vector<1x8xf32>
    %cst_20 = arith.constant 9.99999974E-6 : f32
    %35 = vector.broadcast %cst_20 : f32 to vector<1x8xf32>
    %36 = arith.addf %34, %35 : vector<1x8xf32>
    %37 = math.rsqrt %36 : vector<1x8xf32>
    %38 = arith.mulf %33, %37 : vector<1x8xf32>
    %c1_21 = arith.constant 1 : index
    %39 = memref.load %arg6[%c1_21] : memref<3xf32, #tpu.memory_space<smem>>
    %40 = vector.broadcast %39 : f32 to vector<1x8xf32>
    %41 = arith.mulf %38, %40 : vector<1x8xf32>
    %c2_22 = arith.constant 2 : index
    %42 = memref.load %arg6[%c2_22] : memref<3xf32, #tpu.memory_space<smem>>
    %43 = vector.broadcast %42 : f32 to vector<1x8xf32>
    %44 = arith.addf %41, %43 : vector<1x8xf32>
    %45 = vector.shape_cast %44 : vector<1x8xf32> to vector<1x1x8xf32>
    %c0_23 = arith.constant 0 : index
    %c0_24 = arith.constant 0 : index
    %c0_25 = arith.constant 0 : index
    %46 = vector.load %arg7[%c0_23, %c0_24, %c0_25] : memref<1x1x8xf32, #tpu.memory_space<vmem>>, vector<1x1x8xf32>
    tpu.vector_store %arg7[%c0_23, %c0_24, %c0_25], %45 {strides = array<i32>} : memref<1x1x8xf32, #tpu.memory_space<vmem>>, vector<1x1x8xf32>,
    return
  }
  func.func @transform_0(%arg0: i32) -> (i32, i32) {
    %c0_i32 = arith.constant 0 : i32
    %c0_i32_0 = arith.constant 0 : i32
    return %arg0, %c0_i32 : i32, i32
  }
  func.func @transform_1(%arg0: i32) -> (i32, i32) {
    %c0_i32 = arith.constant 0 : i32
    %c0_i32_0 = arith.constant 0 : i32
    return %arg0, %c0_i32 : i32, i32
  }
  func.func @transform_2(%arg0: i32) -> (i32, i32) {
    %c0_i32 = arith.constant 0 : i32
    %c0_i32_0 = arith.constant 0 : i32
    %c0_i32_1 = arith.constant 0 : i32
    return %c0_i32, %c0_i32_0 : i32, i32
  }
  func.func @transform_3(%arg0: i32) -> (i32, i32) {
    %c0_i32 = arith.constant 0 : i32
    %c0_i32_0 = arith.constant 0 : i32
    %c0_i32_1 = arith.constant 0 : i32
    return %c0_i32, %c0_i32_0 : i32, i32
  }
  func.func @transform_4(%arg0: i32) -> (i32, i32) {
    %c0_i32 = arith.constant 0 : i32
    %c0_i32_0 = arith.constant 0 : i32
    %c0_i32_1 = arith.constant 0 : i32
    return %c0_i32, %c0_i32_0 : i32, i32
  }
  func.func @transform_5(%arg0: i32) -> i32 {
    %c0_i32 = arith.constant 0 : i32
    %c0_i32_0 = arith.constant 0 : i32
    return %c0_i32 : i32
  }
  func.func @transform_6(%arg0: i32) -> (i32, i32, i32) {
    %c0_i32 = arith.constant 0 : i32
    %c0_i32_0 = arith.constant 0 : i32
    %c0_i32_1 = arith.constant 0 : i32
    return %arg0, %c0_i32, %c0_i32_0 : i32, i32, i32
  }
}

</mosaic_0001>

<bundles_post_ra>
// kernel: tpu_custom_call.1
= control target key start
LH: loop header
LB: loop body
LE: loop exit
PB: predicated region body
PF: predicated region fallthrough
CT: control target
= control target key end

     0   :  { %11 = vsyncpa [#allocation3], 0  ;;  %s793_s0 = inlined_call_operand.hbm [shape: f32[8,24], index: 0, kind: input, shape index: {}]   ;;  %s794_s1 = inlined_call_operand.hbm [shape: f32[8,8], index: 1, kind: input, shape index: {}]   ;;  %s795_s2 = inlined_call_operand.hbm [shape: f32[24,64], index: 2, kind: input, shape index: {}]   ;;  %s796_s3 = inlined_call_operand.vmem [shape: f32[8,64], index: 3, kind: input, shape index: {}]   ;;  %s797_s4 = inlined_call_operand.vmem [shape: f32[3,64], index: 4, kind: input, shape index: {}]   ;;  %s798_s5 = inlined_call_operand.vmem [shape: f32[3], index: 5, kind: input, shape index: {}]   ;;  %s799_s6 = inlined_call_operand.hbm [shape: f32[1,1,8], index: 6, kind: output, shape index: {}]  }
   0x1   :  { %12 = vsyncpa [#allocation7], 0 }
   0x2   :  { %13 = vsyncpa [#allocation5], 0 }
   0x3   :  { %14 = vsyncpa [#allocation4], 0  ;;  %s680_s21 = smov [#allocation6]   ;;  %s681_s23 = smov [#allocation2]  }
   0x4   :  { %s31_s22 = sshll.u32 %s680_s21, 4  ;;  %s21_s24 = sshll.u32 %s681_s23, 4  ;;  %s32_s22 = int_to_ptr.vmem [resolvable:$true] %s31_s22  ;;  %s22_s24 = int_to_ptr.vmem [resolvable:$true] %s21_s24 }
   0x5   :  { %s572_s27 = scalar_lea.hbm %s794_s1, 128 }
   0x6   :  { %p573_p0 = scmp.ne.s32.totalorder %s794_s1, %s572_s27  ;;  %p576_p1 = scmp.lt.u32.totalorder %s572_s27, %s794_s1 }
   0x8   :  { %p578_p2 = pnand %p576_p1, %p573_p0 }
   0xa   :  { %581 = shalt.err (!%p578_p2)
}
   0xb   :  { %s582_s8 = scalar_lea.vmem %s32_s22, 128  ;;  %p587_p4 = scmp.lt.s32.totalorder %s32_s22, %s32_s22 }
   0xc   :  { %p583_p3 = scmp.ne.s32.totalorder %s32_s22, %s582_s8  ;;  %p588_p5 = scmp.lt.s32.totalorder %s582_s8, %s582_s8 }
   0xe   :  { %p589_p6 = por %p588_p5, %p587_p4 }
  0x10   :  { %p590_p7 = pnand %p589_p6, %p583_p3 }
  0x12   :  { %593 = shalt.err (!%p590_p7)
}
  0x13   :  { %34 = dma.hbm_to_vmem [thread:$0]  %s794_s1, 128, %s32_s22, [#allocation7]  }
  0x14   :  { %s594_s13 = scalar_lea.hbm %s793_s0, 128 }
  0x15   :  { %p595_p8 = scmp.ne.s32.totalorder %s793_s0, %s594_s13  ;;  %p598_p9 = scmp.lt.u32.totalorder %s594_s13, %s793_s0 }
  0x17   :  { %p600_p10 = pnand %p598_p9, %p595_p8 }
  0x19   :  { %603 = shalt.err (!%p600_p10)
}
  0x1a   :  { %s604_s18 = scalar_lea.vmem %s22_s24, 128  ;;  %p609_p12 = scmp.lt.s32.totalorder %s22_s24, %s22_s24 }
  0x1b   :  { %p605_p11 = scmp.ne.s32.totalorder %s22_s24, %s604_s18  ;;  %p610_p13 = scmp.lt.s32.totalorder %s604_s18, %s604_s18 }
  0x1d   :  { %p611_p0 = por %p610_p13, %p609_p12 }
  0x1f   :  { %p612_p1 = pnand %p611_p0, %p605_p11 }
  0x21   :  { %615 = shalt.err (!%p612_p1)
}
  0x22   :  { %24 = dma.hbm_to_vmem [thread:$0]  %s793_s0, 128, %s22_s24, [#allocation3]  }
  0x23   :  { %s682_s20 = smov [#allocation8]   ;;  %s57_s25 = sshll.u32 %s798_s5, 4  ;;  %s58_s25 = int_to_ptr.vmem [resolvable:$true] %s57_s25 }
  0x24   :  { %s40_s21 = sshll.u32 %s682_s20, 4  ;;  %s616_s28 = scalar_lea.hbm %s795_s2, 384  ;;  %s41_s21 = int_to_ptr.vmem [resolvable:$true] %s40_s21 }
  0x25   :  { %p617_p2 = scmp.ne.s32.totalorder %s795_s2, %s616_s28  ;;  %p620_p3 = scmp.lt.u32.totalorder %s616_s28, %s795_s2 }
  0x27   :  { %p622_p4 = pnand %p620_p3, %p617_p2 }
  0x29   :  { %625 = shalt.err (!%p622_p4)
}
  0x2a   :  { %s626_s0 = scalar_lea.vmem %s41_s21, 384  ;;  %p631_p6 = scmp.lt.s32.totalorder %s41_s21, %s41_s21 }
  0x2b   :  { %p627_p5 = scmp.ne.s32.totalorder %s41_s21, %s626_s0  ;;  %p632_p7 = scmp.lt.s32.totalorder %s626_s0, %s626_s0 }
  0x2d   :  { %p633_p8 = por %p632_p7, %p631_p6 }
  0x2f   :  { %p634_p9 = pnand %p633_p8, %p627_p5 }
  0x31   :  { %637 = shalt.err (!%p634_p9)
}
  0x32   :  { %s683_s5 = smov 128   ;;  %s684_s24 = smov 8  }
  0x33   :  { %46 = dma.hbm_to_vmem [thread:$0]  %s795_s2, 384, %s41_s21, [#allocation7], %s683_s5, %s683_s5, %s684_s24  }
  0x34   :  { %s638_s11 = scalar_lea.vmem %s58_s25, 16  ;;  %p643_p11 = scmp.lt.s32.totalorder %s58_s25, %s58_s25 }
  0x35   :  { %p639_p10 = scmp.ne.s32.totalorder %s58_s25, %s638_s11  ;;  %p644_p12 = scmp.lt.s32.totalorder %s638_s11, %s638_s11 }
  0x37   :  { %p645_p13 = por %p644_p12, %p643_p11 }
  0x39   :  { %p646_p0 = pnand %p645_p13, %p639_p10 }
  0x3b   :  { %649 = shalt.err (!%p646_p0)
}
  0x3c   :  { %s685_s12 = smov [#allocation9]  }
  0x3d   :  { %60 = dma.vmem_to_smem %s58_s25, 16, %s685_s12, [#allocation5]  }
  0x3e   :  { %672 = dma.done.wait [#allocation3], 128  }
  0x3f   :  { %673 = vsyncadd [#allocation3], 4294967168 }
  0x40   :  { %674 = dma.done.wait [#allocation7], 512  }
  0x41   :  { %675 = vsyncadd [#allocation7], 4294966784 }
  0x42   :  { %676 = dma.done.wait [#allocation5], 16  }
  0x43   :  { %677 = vsyncadd [#allocation5], 4294967280 }
  0x44   :  { %73 = sfence }
  0x45   :  { %v75_v0 = vld [vmem:[#allocation8] sm:$0xff]  ;;  %v76_v1 = vld [vmem:[#allocation8 + $0x8] sm:$0xff]  ;;  %v79_v2 = vld [vmem:[%s796_s3] sm:$0xff]  ;;  %v686_v3 = vmov 0.0|0.0   ;;  %v687_v5 = vmov 0.0   ;;  %vm80_vm0 = vcmask 64512  }
  0x46   :  { %555 = vmatprep.subr.bf16.mxu1 %v686_v3  ;;  %v556_v4 = vpack.c.bf16 %v76_v1, %v75_v0  ;;  %526 = vmatprep.subr.mxu0 %v687_v5  ;;  %v78_v6 = vld [vmem:[#allocation6] sm:$0xff]  ;;  %vm688_vm1 = vmmov 0   ;;  %v77_v7 = vld [vmem:[#allocation8 + $0x10] sm:$0xff]  ;;  %vm154_vm2 = vcmask 195584   ;;  %vm238_vm3 = vcmask 523264   ;;  %s512_s1 = sld [smem:[#allocation9 + $0x1]] }
  0x47   :  { %527 = vmatpush3.msra.mxu0 %v79_v2  ;;  %528 = vmatprep.mubr.msk.f32.mxu0 %vm688_vm1, %v687_v5  ;;  %v74_v8 = vld [vmem:[#allocation2] sm:$0xff]  ;;  %s513_s19 = sld [smem:[#allocation9 + $0x2]]  ;;  %s689_s20 = smov [#allocation10]   ;;  %vm484_vm4 = vcmask 57344  }
  0x48   :  { %557 = vmatpush3.bf16.msra.mxu1 %v556_v4  ;;  %529 = vmatmul.mubr.msk.f32.vlgmr.msra.gmra.mrb[0].mxu0 %vm80_vm0, %v78_v6  ;;  %v505_v12 = vld [vmem:[%s797_s4] ss:$0 sm:$0xff]  ;;  %v237_v18 = vld [vmem:[%s797_s4 + $0x2] sm:$0x1]  ;;  %v236_v19 = vld [vmem:[%s797_s4 + $0x1] sm:$0x1] }
  0x49   :  { %535 = vmatprep.subr.mxu1 %v687_v5  ;;  %537 = vmatprep.mubr.msk.f32.mxu1 %vm688_vm1, %v687_v5  ;;  %s468_s4 = sld [smem:[#allocation9]]  ;;  %s492_s21 = sshll.u32 %s689_s20, 4  ;;  %s493_s21 = int_to_ptr.vmem [resolvable:$true] %s492_s21 }
  0x4a   :  { %540 = vmatprep.subr.mxu0 %v687_v5  ;;  %542 = vmatprep.mubr.msk.f32.mxu0 %vm688_vm1, %v687_v5  ;;  %s650_s22 = scalar_lea.vmem %s493_s21, 16  ;;  %s654_s23 = scalar_lea.vmem %s493_s21, 32 }
  0x4b   :  { %p651_p1 = scmp.ne.s32.totalorder %s493_s21, %s650_s22  ;;  %p655_p2 = scmp.lt.s32.totalorder %s493_s21, %s493_s21 }
  0x4c   :  { %536 = vmatpush3.msra.mxu1 %v77_v7  ;;  %v479_v41 = vstv %s512_s1  ;;  %p656_p3 = scmp.lt.s32.totalorder %s654_s23, %s650_s22 }
  0x4d   :  { %538 = vmatmul.mubr.msk.f32.vlgmr.msra.gmra.mrb[0].mxu1 %vm154_vm2, %v74_v8  ;;  %550 = vmatprep.subr.mxu1 %v687_v5  ;;  %v482_v43 = vstv %s513_s19 }
  0x4e   :  { %552 = vmatprep.mubr.msk.f32.mxu1 %vm688_vm1, %v687_v5  ;;  %p657_p4 = por %p656_p3, %p655_p2 }
  0x4f   :  { %v469_v32 = vstv %s468_s4 }
  0x50   :  { %p658_p5 = pnand %p657_p4, %p651_p1 }
 0x11b   :  { %v150_v9 = vpop.f32.mrb[0].mxu0 }
 0x11c   :  { %v530_v10 = vpop.f32.mrb[1].mxu0 }
 0x120   :  { %v224_v11 = vpop.f32.mrb[0].mxu1 }
 0x121   :  { %v225_v13 = vadd.f32 %v224_v11, %v150_v9  ;;  %v539_v14 = vpop.f32.mrb[1].mxu1 }
 0x123   :  { %v233_v15 = vadd.f32 %v505_v12, %v225_v13 }
 0x125   :  { %v234_v16 = vmul.f32 0.01, %v233_v15 }
 0x127   :  { %v235_v17 = vmax.f32 %v233_v15, %v234_v16 }
 0x129   :  { %541 = vmatpush3.xpose.msk.msra.mxu0 %vm238_vm3, %v235_v17  ;;  %551 = vmatpush3.xpose.msk.msra.mxu1 %vm238_vm3, %v235_v17  ;;  %v315_v20 = vmul.f32 %v235_v17, %v235_v17 }
 0x12a   :  { %545 = vmatprep.subr.mxu0 %v687_v5 }
 0x12c   :  { %543 = vmatmul.mubr.msk.f32.vlgmr.msra.gmra.mrb[2].mxu0 %vm238_vm3, %v237_v18  ;;  %553 = vmatmul.mubr.msk.f32.vlgmr.msra.gmra.mrb[2].mxu1 %vm238_vm3, %v236_v19 }
 0x12d   :  { %546 = vmatpush3.xpose.msk.msra.mxu0 %vm238_vm3, %v315_v20  ;;  %547 = vmatprep.mubr.msk.f32.mxu0 %vm688_vm1, %v687_v5 }
 0x130   :  { %548 = vmatmul.mubr.msk.f32.vlgmr.msra.gmra.mrb[4].mxu0 %vm238_vm3, %v237_v18 }
 0x1ff   :  { %v311_v21 = vpop.f32.mrb[2].mxu0  ;;  %v458_v22 = vpop.f32.mrb[2].mxu1 }
 0x200   :  { %v544_v23 = vpop.f32.mrb[3].mxu0  ;;  %v554_v24 = vpop.f32.mrb[3].mxu1  ;;  %v462_v25 = vmul.f32 %v311_v21, %v311_v21 }
 0x203   :  { %v385_v26 = vpop.f32.mrb[4].mxu0 }
 0x204   :  { %v463_v27 = vsub.f32 %v385_v26, %v462_v25  ;;  %v549_v28 = vpop.f32.mrb[5].mxu0 }
 0x206   :  { %v464_v29 = vmax.f32 %v463_v27, 0.0 }
 0x208   :  { %v465_v30 = vadd.f32 1e-05, %v464_v29 }
 0x20a   :  { %568 = vrsqrt.f32 %v465_v30 }
 0x214   :  { %v569_v31 = vpop.eup %568 }
 0x215   :  { %v467_v33 = vmul.f32 %v569_v31, %v458_v22 }
 0x217   :  { %v470_v34 = vadd.f32 %v469_v32, %v467_v33 }
 0x219   :  { %v471_v35 = vmul.f32 0.01, %v470_v34 }
 0x21b   :  { %v472_v36 = vmax.f32 %v470_v34, %v471_v35 }
 0x21d   :  { %v473_v37 = vsub.f32 %v472_v36, %v472_v36 }
 0x21f   :  { %v474_v38 = vmul.f32 %v473_v37, %v473_v37 }
 0x221   :  { %v475_v39 = vadd.f32 1e-05, %v474_v38 }
 0x223   :  { %570 = vrsqrt.f32 %v475_v39 }
 0x22d   :  { %v571_v40 = vpop.eup %570 }
 0x22e   :  { %v477_v42 = vmul.f32 %v571_v40, %v473_v37 }
 0x230   :  { %v480_v44 = vmul.f32 %v479_v41, %v477_v42 }
 0x232   :  { %v483_v45 = vadd.f32 %v482_v43, %v480_v44 }
 0x234   :  { %485 = vst.msk [vmem:[#allocation10] sm:$0x1] %vm484_vm4, %v483_v45 }
 0x235   :  { %661 = shalt.err (!%p658_p5)
}
 0x236   :  { %s662_s27 = scalar_lea.hbm %s799_s6, 16 }
 0x237   :  { %p663_p6 = scmp.ne.s32.totalorder %s799_s6, %s662_s27  ;;  %p666_p7 = scmp.lt.u32.totalorder %s662_s27, %s799_s6 }
 0x239   :  { %p668_p8 = pnand %p666_p7, %p663_p6 }
 0x23b   :  { %671 = shalt.err (!%p668_p8)
}
 0x23c   :  { %495 = dma.vmem_to_hbm [thread:$0]  %s493_s21, 16, %s799_s6, [#allocation4]  }
 0x23d   :  { %678 = dma.done.wait [#allocation4], 16  }
 0x23e   :  { %679 = vsyncadd [#allocation4], 4294967280 }
 0x23f   :  { %499 = vsyncpa [#allocation3], 1 }
 0x240   :  { %500 = vsyncpa [#allocation7], 1 }
 0x241   :  { %501 = vsyncpa [#allocation4], 1 }
 0x242   :  { %502 = vsyncpa [#allocation5], 1 }

</bundles_post_ra>
